<compile_context>
chip_gen: v6e
topology: v6e:2x2x1
jax: 0.10.0
libtpu: 0.0.40
codegen_flags: <defaults>
</compile_context>

<pallas_src>
import functools

import jax
import jax.numpy as jnp
from jax.experimental import pallas as pl
from jax.experimental.pallas import tpu as pltpu

LANE = 128
_BN_EPS = 1e-5

# Tile sizes for the row-tiled (pipelined) large-graph path.
_TILE_M = 256      # adjacency row block
_TILE_K = 512      # adjacency column (reduction) block


def _round_up(v, m):
    return ((v + m - 1) // m) * m


def _vmem_limit_bytes():
    """Generation-aware scoped-VMEM limit (v5e/v6e ~100 MiB, v7x ~51 MiB)."""
    try:
        cap = int(pltpu.get_tpu_info().vmem_capacity_bytes)
    except Exception:
        cap = 64 * 1024 * 1024          # conservative fallback (v7x-sized)
    return min(int(cap * 0.8), 100 * 1024 * 1024)


# ---------------------------------------------------------------------------
# Fused single-VMEM kernel (no grid -> single-buffered whole-array residents).
# ---------------------------------------------------------------------------
def _fused_kernel(reorder, *refs):
    if reorder:                          # only when padded i_p < padded h_p
        (adj_ref, rs_ref, x_ref, w0_ref, b0_ref, s0_ref,
         w1_ref, b1_ref, o_ref) = refs
    else:
        (adj_ref, x_ref, w0_ref, b0_ref, s0_ref,
         w1_ref, b1_ref, o_ref) = refs

    adj = adj_ref[...]                   # bf16, pre-normalized in the wrapper

    if reorder:
        # (adj @ x) @ W0' is cheaper when i_p < h_p; bias-before-aggregation
        # is preserved exactly via rowsum(adj) (outer) b0' (rowsum is exact
        # f32, precomputed in the wrapper).
        ax = jnp.dot(adj, x_ref[...], preferred_element_type=jnp.float32)
        h = jnp.dot(ax.astype(jnp.bfloat16), w0_ref[...],
                    preferred_element_type=jnp.float32)
        h = h + rs_ref[...] * b0_ref[...] + s0_ref[...]
    else:
        xw = jnp.dot(x_ref[...], w0_ref[...],
                     preferred_element_type=jnp.float32) + b0_ref[...]
        h = jnp.dot(adj, xw.astype(jnp.bfloat16),
                    preferred_element_type=jnp.float32) + s0_ref[...]
    h = jnp.maximum(h, 0.0)              # folded BN shift + ReLU

    hw = jnp.dot(h.astype(jnp.bfloat16), w1_ref[...],
                 preferred_element_type=jnp.float32) + b1_ref[...]
    o_ref[...] = jnp.dot(adj, hw.astype(jnp.bfloat16),
                         preferred_element_type=jnp.float32)


def _fused_call(reorder, operands, n_p, o_p, vmem_limit):
    vspec = pl.BlockSpec(memory_space=pltpu.MemorySpace.VMEM)
    return pl.pallas_call(
        functools.partial(_fused_kernel, reorder),
        out_shape=jax.ShapeDtypeStruct((n_p, o_p), jnp.float32),
        in_specs=[vspec] * len(operands),
        out_specs=vspec,
        compiler_params=pltpu.CompilerParams(vmem_limit_bytes=vmem_limit),
    )(*operands)


# ---------------------------------------------------------------------------
# Row-tiled, pipelined path (replaces the old NotImplementedError cliff).
# ---------------------------------------------------------------------------
def _feat_kernel(x_ref, w_ref, b_ref, o_ref):
    # y = x @ W + b on a row block (bias added BEFORE aggregation, as in the
    # reference GCNLayer).
    y = jnp.dot(x_ref[...], w_ref[...],
                preferred_element_type=jnp.float32) + b_ref[...]
    o_ref[...] = y.astype(o_ref.dtype)


def _feat_call(x, w, b, out_dtype, vmem_limit, bm=_TILE_M):
    n_p, cin = x.shape
    cout = w.shape[1]
    return pl.pallas_call(
        _feat_kernel,
        out_shape=jax.ShapeDtypeStruct((n_p, cout), out_dtype),
        grid=(n_p // bm,),
        in_specs=[pl.BlockSpec((bm, cin), lambda i: (i, 0)),
                  pl.BlockSpec((cin, cout), lambda i: (0, 0)),
                  pl.BlockSpec((1, cout), lambda i: (0, 0))],
        out_specs=pl.BlockSpec((bm, cout), lambda i: (i, 0)),
        compiler_params=pltpu.CompilerParams(
            dimension_semantics=("parallel",),
            vmem_limit_bytes=vmem_limit),
    )(x, w, b)


def _agg_kernel(activate, adj_ref, y_ref, s_ref, o_ref, acc_ref):
    # out[i] = (optionally relu of) sum_k adj[i, k] @ y[k]  + shift
    @pl.when(pl.program_id(1) == 0)
    def _():
        acc_ref[...] = jnp.zeros_like(acc_ref)

    acc_ref[...] += jnp.dot(adj_ref[...], y_ref[...],
                            preferred_element_type=jnp.float32)

    @pl.when(pl.program_id(1) == pl.num_programs(1) - 1)
    def _():
        r = acc_ref[...] + s_ref[...]
        if activate:                     # static flag: layer-0 BN shift + ReLU
            r = jnp.maximum(r, 0.0)
        o_ref[...] = r.astype(o_ref.dtype)


def _agg_call(adj, y, shift, activate, out_dtype, vmem_limit,
              bm=_TILE_M, bk=_TILE_K):
    n_p = adj.shape[0]
    c = y.shape[1]
    return pl.pallas_call(
        functools.partial(_agg_kernel, activate),
        out_shape=jax.ShapeDtypeStruct((n_p, c), out_dtype),
        grid=(n_p // bm, n_p // bk),
        in_specs=[pl.BlockSpec((bm, bk), lambda i, k: (i, k)),
                  pl.BlockSpec((bk, c), lambda i, k: (k, 0)),
                  pl.BlockSpec((1, c), lambda i, k: (0, 0))],
        out_specs=pl.BlockSpec((bm, c), lambda i, k: (i, 0)),
        scratch_shapes=[pltpu.VMEM((bm, c), jnp.float32)],
        compiler_params=pltpu.CompilerParams(
            dimension_semantics=("parallel", "arbitrary"),
            vmem_limit_bytes=vmem_limit),
    )(adj, y, shift)


# ---------------------------------------------------------------------------
# Full forward pass: graph prep / BN folding / padding in JAX (fused by XLA
# into the pad/cast producers), hot path in Pallas.
# ---------------------------------------------------------------------------
@functools.partial(jax.jit, static_argnames=("force_tiled",))
def geomix1_forward(x, edge_index, params, force_tiled=False):
    n, in_c = x.shape
    hid_c = params["w0"].shape[1]
    out_c = params["w1"].shape[1]

    vmem_limit = _vmem_limit_bytes()

    # Padded (lane-dense) feature dims.
    i_p = _round_up(in_c, LANE)
    h_p = _round_up(hid_c, LANE)
    o_p = _round_up(out_c, LANE)

    # Fused-path resident-VMEM estimate (single-buffered: no grid) against the
    # generation-aware budget; otherwise take the row-tiled pipelined path.
    n_fused = _round_up(n, LANE)
    fused_bytes = (
        2 * n_fused * n_fused                                   # adj (bf16)
        + 2 * n_fused * i_p                                     # x (bf16)
        + 4 * n_fused * o_p                                     # out (f32)
        + n_fused * (12 * h_p + 6 * o_p + 6 * max(i_p, h_p))    # intermediates
        + 2 * (i_p * h_p + h_p * o_p) + 16 * (h_p + o_p))       # weights/bias
    use_fused = (not force_tiled) and fused_bytes <= int(0.6 * vmem_limit)

    n_p = n_fused if use_fused else _round_up(n, _TILE_K)

    # Dense adjacency built directly at padded size; remove + re-add self
    # loops => diag = 1 for real nodes, padded rows/cols stay exact zeros.
    # TODO(synk): duplicate edges are de-duplicated by the scatter-set here,
    # whereas torch.sparse.mm would sum them (toy graphs have no duplicates).
    src, dst = edge_index[0], edge_index[1]
    a = jnp.zeros((n_p, n_p), jnp.float32).at[src, dst].set(1.0)
    diag = jnp.arange(n)
    a = a.at[diag, diag].set(1.0)

    # get_edge_weight: in-degree (column-sum) symmetric normalization, fused
    # with the bf16 cast so the kernels see a single bf16 adjacency operand.
    deg = jnp.sum(a, axis=0)
    dinv = jnp.where(deg > 0.0, jax.lax.rsqrt(deg), 0.0)
    adj_bf = (a * dinv[:, None] * dinv[None, :]).astype(jnp.bfloat16)

    # Fold eval-mode BatchNorm1d into layer 0 (column scaling commutes with
    # the adjacency left-multiply): scale into W0/b0, keep the additive shift.
    gamma, beta, mean, var = params["bn0"]
    bn_scale = gamma * jax.lax.rsqrt(var + _BN_EPS)
    w0f = params["w0"] * bn_scale
    b0f = params["b0"] * bn_scale
    shift0 = beta - mean * bn_scale

    def pad2(m, rows, cols):
        return jnp.pad(m, ((0, rows - m.shape[0]), (0, cols - m.shape[1])))

    x_bf = pad2(x.astype(jnp.bfloat16), n_p, i_p)
    w0_bf = pad2(w0f.astype(jnp.bfloat16), i_p, h_p)
    w1_bf = pad2(params["w1"].astype(jnp.bfloat16), h_p, o_p)
    b0_p = pad2(b0f, 1, h_p)
    s0_p = pad2(shift0, 1, h_p)
    b1_p = pad2(params["b1"], 1, o_p)

    if use_fused:
        # Layer-0 ordering picked from the PADDED dims: the reorder only pays
        # when i_p < h_p (otherwise the rank-1 rowsum correction is overhead).
        reorder = i_p < h_p
        if reorder:
            rowsum = (dinv * (a @ dinv))[:, None]    # exact f32 rowsum(adj)
            operands = (adj_bf, rowsum, x_bf, w0_bf, b0_p, s0_p, w1_bf, b1_p)
        else:
            operands = (adj_bf, x_bf, w0_bf, b0_p, s0_p, w1_bf, b1_p)
        out_p = _fused_call(reorder, operands, n_p, o_p, vmem_limit)
    else:
        # Row-tiled pipelined path: two feature transforms + two aggregations.
        xw = _feat_call(x_bf, w0_bf, b0_p, jnp.bfloat16, vmem_limit)
        h = _agg_call(adj_bf, xw, s0_p, True, jnp.bfloat16, vmem_limit)
        hw = _feat_call(h, w1_bf, b1_p, jnp.bfloat16, vmem_limit)
        zero_s = jnp.zeros((1, o_p), jnp.float32)
        out_p = _agg_call(adj_bf, hw, zero_s, False, jnp.float32, vmem_limit)

    return out_p[:n, :out_c]


def reference_forward(x, edge_index, params):
    """Pure-JAX f32 reference of the eval-mode PyTorch forward."""
    n = x.shape[0]
    src, dst = edge_index[0], edge_index[1]
    a = jnp.zeros((n, n), jnp.float32).at[src, dst].set(1.0)
    diag = jnp.arange(n)
    a = a.at[diag, diag].set(1.0)
    deg = jnp.sum(a, axis=0)
    dinv = jnp.where(deg > 0.0, jax.lax.rsqrt(deg), 0.0)
    adj = a * dinv[None, :] * dinv[:, None]

    gamma, beta, mean, var = params["bn0"]
    z = adj @ (x @ params["w0"] + params["b0"])
    h = jnp.maximum((z - mean) * jax.lax.rsqrt(var + _BN_EPS) * gamma + beta, 0.0)
    return adj @ (h @ params["w1"] + params["b1"])


def init_params(key, in_channels, hidden_channels, out_channels):
    k = jax.random.split(key, 6)

    def glorot(rng, fan_in, fan_out):
        s = jnp.sqrt(6.0 / (fan_in + fan_out))
        return jax.random.uniform(rng, (fan_in, fan_out), jnp.float32, -s, s)

    return {
        "w0": glorot(k[0], in_channels, hidden_channels),
        "b0": jnp.zeros((1, hidden_channels), jnp.float32),
        "w1": glorot(k[1], hidden_channels, out_channels),
        "b1": jnp.zeros((1, out_channels), jnp.float32),
        # deterministic "trained" BatchNorm1d(hidden_channels) stats
        "bn0": (
            1.0 + 0.1 * jax.random.normal(k[2], (1, hidden_channels)),     # gamma
            0.1 * jax.random.normal(k[3], (1, hidden_channels)),           # beta
            0.1 * jax.random.normal(k[4], (1, hidden_channels)),           # running_mean
            jnp.abs(jax.random.normal(k[5], (1, hidden_channels))) + 0.5,  # running_var
        ),
    }


if __name__ == "__main__":
    key = jax.random.PRNGKey(0)

    def ring_edges(n):
        idx = jnp.arange(n)
        src = jnp.concatenate([idx, idx])
        dst = jnp.concatenate([(idx + 1) % n, (idx - 1) % n])
        return jnp.stack([src, dst]).astype(jnp.int32)

    def run_case(kx, kp, n, in_c, hid_c, out_c, force_tiled):
        x = jax.random.normal(kx, (n, in_c), jnp.float32)
        edge_index = ring_edges(n)
        params = init_params(kp, in_c, hid_c, out_c)
        out = geomix1_forward(x, edge_index, params, force_tiled=force_tiled)
        jax.block_until_ready(out)
        assert out.shape == (n, out_c) and out.dtype == jnp.float32
        ref = reference_forward(x, edge_index, params)
        err = jnp.max(jnp.abs(out - ref))
        assert jnp.allclose(out, ref, rtol=5e-2, atol=5e-2), f"max abs err {err}"

    keys = jax.random.split(key, 6)
    # 1) fused path, direct layer-0 ordering (i_p == h_p after padding)
    run_case(keys[0], keys[1], n=16, in_c=8, hid_c=32, out_c=8, force_tiled=False)
    # 2) fused path, reordered layer-0 ordering (i_p < h_p after padding)
    run_case(keys[2], keys[3], n=16, in_c=8, hid_c=200, out_c=8, force_tiled=False)
    # 3) row-tiled pipelined large-graph path, forced on a graph big enough to
    #    exercise the (row_block, k_block) accumulation grid
    run_case(keys[4], keys[5], n=1000, in_c=8, hid_c=32, out_c=8, force_tiled=True)

    print("KERNEL_OK")
</pallas_src>

<mosaic_0001>
module attributes {stable_mosaic.version = 11 : i64} {
  func.func @_fused_kernel(%arg0: memref<128x128xbf16, #tpu.memory_space<vmem>>, %arg1: memref<128x128xbf16, #tpu.memory_space<vmem>>, %arg2: memref<128x128xbf16, #tpu.memory_space<vmem>>, %arg3: memref<1x128xf32, #tpu.memory_space<vmem>>, %arg4: memref<1x128xf32, #tpu.memory_space<vmem>>, %arg5: memref<128x128xbf16, #tpu.memory_space<vmem>>, %arg6: memref<1x128xf32, #tpu.memory_space<vmem>>, %arg7: memref<128x128xf32, #tpu.memory_space<vmem>>) attributes {dimension_semantics = [], scalar_prefetch = 0 : i64, scratch_operands = 0 : i64, tpu.core_type = #tpu.core_type<tc>} {
    %c0 = arith.constant 0 : index
    %c0_0 = arith.constant 0 : index
    %0 = vector.load %arg0[%c0, %c0_0] : memref<128x128xbf16, #tpu.memory_space<vmem>>, vector<128x128xbf16>
    %c0_1 = arith.constant 0 : index
    %c0_2 = arith.constant 0 : index
    %1 = vector.load %arg1[%c0_1, %c0_2] : memref<128x128xbf16, #tpu.memory_space<vmem>>, vector<128x128xbf16>
    %c0_3 = arith.constant 0 : index
    %c0_4 = arith.constant 0 : index
    %2 = vector.load %arg2[%c0_3, %c0_4] : memref<128x128xbf16, #tpu.memory_space<vmem>>, vector<128x128xbf16>
    %cst = arith.constant dense<0.000000e+00> : vector<128x128xf32>
    %3 = tpu.matmul %1, %2, %cst {dimension_numbers = #tpu.dot_dimension_numbers<[1], [0], [0], [1], [0, 0, 1, 1], [], []>} : vector<128x128xbf16>, vector<128x128xbf16>, vector<128x128xf32> -> vector<128x128xf32>
    %c0_5 = arith.constant 0 : index
    %c0_6 = arith.constant 0 : index
    %4 = vector.load %arg3[%c0_5, %c0_6] : memref<1x128xf32, #tpu.memory_space<vmem>>, vector<1x128xf32>
    %5 = vector.broadcast %4 : vector<1x128xf32> to vector<128x128xf32>
    %6 = arith.addf %3, %5 : vector<128x128xf32>
    %7 = arith.truncf %6 : vector<128x128xf32> to vector<128x128xbf16>
    %cst_7 = arith.constant dense<0.000000e+00> : vector<128x128xf32>
    %8 = tpu.matmul %0, %7, %cst_7 {dimension_numbers = #tpu.dot_dimension_numbers<[1], [0], [0], [1], [0, 0, 1, 1], [], []>} : vector<128x128xbf16>, vector<128x128xbf16>, vector<128x128xf32> -> vector<128x128xf32>
    %c0_8 = arith.constant 0 : index
    %c0_9 = arith.constant 0 : index
    %9 = vector.load %arg4[%c0_8, %c0_9] : memref<1x128xf32, #tpu.memory_space<vmem>>, vector<1x128xf32>
    %10 = vector.broadcast %9 : vector<1x128xf32> to vector<128x128xf32>
    %11 = arith.addf %8, %10 : vector<128x128xf32>
    %cst_10 = arith.constant 0.000000e+00 : f32
    %12 = vector.broadcast %cst_10 : f32 to vector<128x128xf32>
    %13 = arith.maximumf %11, %12 : vector<128x128xf32>
    %14 = arith.truncf %13 : vector<128x128xf32> to vector<128x128xbf16>
    %c0_11 = arith.constant 0 : index
    %c0_12 = arith.constant 0 : index
    %15 = vector.load %arg5[%c0_11, %c0_12] : memref<128x128xbf16, #tpu.memory_space<vmem>>, vector<128x128xbf16>
    %cst_13 = arith.constant dense<0.000000e+00> : vector<128x128xf32>
    %16 = tpu.matmul %14, %15, %cst_13 {dimension_numbers = #tpu.dot_dimension_numbers<[1], [0], [0], [1], [0, 0, 1, 1], [], []>} : vector<128x128xbf16>, vector<128x128xbf16>, vector<128x128xf32> -> vector<128x128xf32>
    %c0_14 = arith.constant 0 : index
    %c0_15 = arith.constant 0 : index
    %17 = vector.load %arg6[%c0_14, %c0_15] : memref<1x128xf32, #tpu.memory_space<vmem>>, vector<1x128xf32>
    %18 = vector.broadcast %17 : vector<1x128xf32> to vector<128x128xf32>
    %19 = arith.addf %16, %18 : vector<128x128xf32>
    %20 = arith.truncf %19 : vector<128x128xf32> to vector<128x128xbf16>
    %cst_16 = arith.constant dense<0.000000e+00> : vector<128x128xf32>
    %21 = tpu.matmul %0, %20, %cst_16 {dimension_numbers = #tpu.dot_dimension_numbers<[1], [0], [0], [1], [0, 0, 1, 1], [], []>} : vector<128x128xbf16>, vector<128x128xbf16>, vector<128x128xf32> -> vector<128x128xf32>
    %c0_17 = arith.constant 0 : index
    %c0_18 = arith.constant 0 : index
    %22 = vector.load %arg7[%c0_17, %c0_18] : memref<128x128xf32, #tpu.memory_space<vmem>>, vector<128x128xf32>
    tpu.vector_store %arg7[%c0_17, %c0_18], %21 {strides = array<i32>} : memref<128x128xf32, #tpu.memory_space<vmem>>, vector<128x128xf32>,
    return
  }
}

</mosaic_0001>

<bundles_post_ra>
// kernel: geomix1_forward.1
= control target key start
LH: loop header
LB: loop body
LE: loop exit
PB: predicated region body
PF: predicated region fallthrough
CT: control target
= control target key end

     0   :  { %s1236_s2 = inlined_call_operand.vmem [shape: bf16[128,128], index: 2, kind: input, shape index: {}]   ;;  %s1237_s1 = inlined_call_operand.vmem [shape: bf16[128,128], index: 1, kind: input, shape index: {}]   ;;  %s1238_s0 = inlined_call_operand.vmem [shape: bf16[128,128], index: 0, kind: input, shape index: {}]   ;;  %s1239_s5 = inlined_call_operand.vmem [shape: bf16[128,128], index: 5, kind: input, shape index: {}]   ;;  %s1240_s3 = inlined_call_operand.vmem [shape: f32[1,128], index: 3, kind: input, shape index: {}]   ;;  %s1241_s4 = inlined_call_operand.vmem [shape: f32[1,128], index: 4, kind: input, shape index: {}]   ;;  %s1242_s6 = inlined_call_operand.vmem [shape: f32[1,128], index: 6, kind: input, shape index: {}]   ;;  %s1243_s7 = inlined_call_operand.vmem [shape: f32[128,128], index: 7, kind: output, shape index: {}]  }
   0x1   :  { %v979_v0 = vld [vmem:[%s1236_s2 + $0x38] sm:$0xff]   ;;  %v980_v1 = vld [vmem:[%s1236_s2 + $0x30] sm:$0xff]   ;;  %v981_v2 = vld [vmem:[%s1236_s2 + $0x28] sm:$0xff]  }
   0x2   :  { %851 = vmatprep.subr.bf16.mxu0 %v979_v0  ;;  %v982_v3 = vld [vmem:[%s1236_s2 + $0x20] sm:$0xff]   ;;  %v983_v5 = vld [vmem:[%s1236_s2 + $0x18] sm:$0xff]   ;;  %v984_v6 = vld [vmem:[%s1236_s2 + $0x10] sm:$0xff]  }
   0x3   :  { %852 = vmatpush3.bf16.msra.mxu0 %v979_v0  ;;  %v987_v4 = vld [vmem:[%s1237_s1] sm:$0xff]   ;;  %v985_v7 = vld [vmem:[%s1236_s2 + $0x8] sm:$0xff]   ;;  %v989_v10 = vld [vmem:[%s1237_s1 + $0x10] sm:$0xff]  }
   0x4   :  { %853 = vmatprep.subr.bf16.mxu0 %v980_v1  ;;  %867 = vmatprep.mubr.bf16.mxu0 %v987_v4  ;;  %v986_v8 = vld [vmem:[%s1236_s2] sm:$0xff]   ;;  %v988_v9 = vld [vmem:[%s1237_s1 + $0x8] sm:$0xff]   ;;  %v990_v11 = vld [vmem:[%s1237_s1 + $0x18] sm:$0xff]  }
   0x5   :  { %v991_v12 = vld [vmem:[%s1237_s1 + $0x20] sm:$0xff]   ;;  %v992_v13 = vld [vmem:[%s1237_s1 + $0x28] sm:$0xff]   ;;  %v993_v14 = vld [vmem:[%s1237_s1 + $0x30] sm:$0xff]  }
   0x6   :  { %v994_v15 = vld [vmem:[%s1237_s1 + $0x38] sm:$0xff]   ;;  %v1102_v16 = vld [vmem:[%s1238_s0] sm:$0xff]   ;;  %v1004_v18 = vld [vmem:[%s1239_s5 + $0x30] sm:$0xff]  }
   0x7   :  { %854 = vmatpush3.bf16.msra.mxu0 %v980_v1  ;;  %899 = vmatprep.mubr.bf16.mxu1 %v1102_v16  ;;  %v1003_v17 = vld [vmem:[%s1239_s5 + $0x38] sm:$0xff]   ;;  %v1005_v19 = vld [vmem:[%s1239_s5 + $0x28] sm:$0xff]   ;;  %v1006_v20 = vld [vmem:[%s1239_s5 + $0x20] sm:$0xff]  }
   0x8   :  { %855 = vmatprep.subr.bf16.mxu0 %v981_v2  ;;  %v1007_v21 = vld [vmem:[%s1239_s5 + $0x18] sm:$0xff]   ;;  %v752_v36 = vld [vmem:[%s1240_s3] ss:$0 sm:$0xff]  ;;  %v1126_v63 = vld [vmem:[%s1238_s0 + $0x8] sm:$0xff]  }
   0x9   :  { %v1131_v0 = vld [vmem:[%s1238_s0 + $0x10] sm:$0xff]   ;;  %v1138_v1 = vld [vmem:[%s1238_s0 + $0x18] sm:$0xff]  }
   0xa   :  { %v1155_v4 = vld [vmem:[%s1238_s0 + $0x30] sm:$0xff]  }
   0xb   :  { %856 = vmatpush3.bf16.msra.mxu0 %v981_v2  ;;  %v1143_v2 = vld [vmem:[%s1238_s0 + $0x20] sm:$0xff]  }
   0xc   :  { %857 = vmatprep.subr.bf16.mxu0 %v982_v3 }
   0xf   :  { %858 = vmatpush3.bf16.msra.mxu0 %v982_v3  ;;  %v1150_v3 = vld [vmem:[%s1238_s0 + $0x28] sm:$0xff]  }
  0x10   :  { %859 = vmatprep.subr.bf16.mxu0 %v983_v5 }
  0x13   :  { %860 = vmatpush3.bf16.msra.mxu0 %v983_v5  ;;  %v1162_v5 = vld [vmem:[%s1238_s0 + $0x38] sm:$0xff]  }
  0x14   :  { %861 = vmatprep.subr.bf16.mxu0 %v984_v6 }
  0x17   :  { %862 = vmatpush3.bf16.msra.mxu0 %v984_v6  ;;  %v1008_v6 = vld [vmem:[%s1239_s5 + $0x10] sm:$0xff]  }
  0x18   :  { %863 = vmatprep.subr.bf16.mxu0 %v985_v7 }
  0x1b   :  { %864 = vmatpush3.bf16.msra.mxu0 %v985_v7  ;;  %v1009_v7 = vld [vmem:[%s1239_s5 + $0x8] sm:$0xff]  }
  0x1c   :  { %865 = vmatprep.subr.bf16.mxu0 %v986_v8 }
  0x1f   :  { %866 = vmatpush3.bf16.msra.mxu0 %v986_v8  ;;  %v1010_v8 = vld [vmem:[%s1239_s5] sm:$0xff]  }
  0x20   :  { %915 = vmatprep.subr.bf16.mxu0 %v1003_v17 }
  0x22   :  { %868 = vmatmul.mubr.bf16.vlgmr.msra.gmra.mxu0 %v988_v9 }
  0x23   :  { %871 = vmatprep.mubr.bf16.mxu0 %v989_v10  ;;  %916 = vmatpush3.bf16.msra.mxu0 %v1003_v17 }
  0x24   :  { %917 = vmatprep.subr.bf16.mxu0 %v1004_v18 }
  0x27   :  { %918 = vmatpush3.bf16.msra.mxu0 %v1004_v18 }
  0x28   :  { %919 = vmatprep.subr.bf16.mxu0 %v1005_v19 }
  0x2a   :  { %872 = vmatmul.mubr.bf16.gmra.mxu0 %v990_v11  ;;  %v769_v11 = vld [vmem:[%s1241_s4] ss:$0 sm:$0xff] }
  0x2b   :  { %875 = vmatprep.mubr.bf16.mxu0 %v991_v12  ;;  %920 = vmatpush3.bf16.msra.mxu0 %v1005_v19 }
  0x2c   :  { %921 = vmatprep.subr.bf16.mxu0 %v1006_v20 }
  0x2f   :  { %922 = vmatpush3.bf16.msra.mxu0 %v1006_v20 }
  0x30   :  { %923 = vmatprep.subr.bf16.mxu0 %v1007_v21 }
  0x32   :  { %876 = vmatmul.mubr.bf16.gmra.mxu0 %v992_v13 }
  0x33   :  { %879 = vmatprep.mubr.bf16.mxu0 %v993_v14  ;;  %924 = vmatpush3.bf16.msra.mxu0 %v1007_v21 }
  0x34   :  { %925 = vmatprep.subr.bf16.mxu0 %v1008_v6 }
  0x37   :  { %926 = vmatpush3.bf16.msra.mxu0 %v1008_v6 }
  0x38   :  { %927 = vmatprep.subr.bf16.mxu0 %v1009_v7 }
  0x3a   :  { %880 = vmatmul.mubr.bf16.gmra.mxu0 %v994_v15 }
  0x3b   :  { %928 = vmatpush3.bf16.msra.mxu0 %v1009_v7 }
  0x3c   :  { %929 = vmatprep.subr.bf16.mxu0 %v1010_v8 }
  0x3f   :  { %930 = vmatpush3.bf16.msra.mxu0 %v1010_v8 }
  0xe2   :  { %v869_v22 = vpop.f32.mrf.mxu0 }
  0xe3   :  { %v221_v58 = vadd.f32 %v869_v22, %v752_v36 }
  0xe4   :  { %v212_v23 = vpop.f32.mrf.mxu0 }
  0xe5   :  { %v213_v61 = vadd.f32 %v752_v36, %v212_v23 }
  0xe6   :  { %v870_v24 = vpop.f32.mrf.mxu0 }
  0xe7   :  { %v224_v56 = vadd.f32 %v870_v24, %v752_v36 }
  0xe8   :  { %v215_v25 = vpop.f32.mrf.mxu0 }
  0xe9   :  { %v276_v59 = vpack.c.bf16 %v224_v56, %v221_v58  ;;  %v216_v60 = vadd.f32 %v752_v36, %v215_v25 }
  0xea   :  { %v873_v26 = vpop.f32.mrf.mxu0 }
  0xeb   :  { %v237_v52 = vadd.f32 %v873_v26, %v752_v36  ;;  %v275_v62 = vpack.c.bf16 %v216_v60, %v213_v61 }
  0xec   :  { %v228_v27 = vpop.f32.mrf.mxu0 }
  0xed   :  { %v229_v55 = vadd.f32 %v752_v36, %v228_v27 }
  0xee   :  { %v874_v28 = vpop.f32.mrf.mxu0 }
  0xef   :  { %v240_v50 = vadd.f32 %v874_v28, %v752_v36 }
  0xf0   :  { %v231_v29 = vpop.f32.mrf.mxu0 }
  0xf1   :  { %v278_v53 = vpack.c.bf16 %v240_v50, %v237_v52  ;;  %v232_v54 = vadd.f32 %v752_v36, %v231_v29 }
  0xf2   :  { %v877_v30 = vpop.f32.mrf.mxu0 }
  0xf3   :  { %v253_v46 = vadd.f32 %v877_v30, %v752_v36  ;;  %v277_v57 = vpack.c.bf16 %v232_v54, %v229_v55 }
  0xf4   :  { %v244_v31 = vpop.f32.mrf.mxu0 }
  0xf5   :  { %v245_v49 = vadd.f32 %v752_v36, %v244_v31 }
  0xf6   :  { %v878_v32 = vpop.f32.mrf.mxu0 }
  0xf7   :  { %v256_v44 = vadd.f32 %v878_v32, %v752_v36 }
  0xf8   :  { %v247_v33 = vpop.f32.mrf.mxu0 }
  0xf9   :  { %v280_v47 = vpack.c.bf16 %v256_v44, %v253_v46  ;;  %v248_v48 = vadd.f32 %v752_v36, %v247_v33 }
  0xfa   :  { %v881_v34 = vpop.f32.mrf.mxu0 }
  0xfb   :  { %v269_v38 = vadd.f32 %v881_v34, %v752_v36  ;;  %v279_v51 = vpack.c.bf16 %v248_v48, %v245_v49 }
  0xfc   :  { %v260_v35 = vpop.f32.mrf.mxu0 }
  0xfd   :  { %v261_v41 = vadd.f32 %v752_v36, %v260_v35 }
  0xfe   :  { %v882_v37 = vpop.f32.mrf.mxu0 }
  0xff   :  { %v272_v39 = vadd.f32 %v882_v37, %v752_v36 }
 0x100   :  { %v263_v40 = vpop.f32.mrf.mxu0 }
 0x101   :  { %v264_v42 = vadd.f32 %v752_v36, %v263_v40  ;;  %v282_v43 = vpack.c.bf16 %v272_v39, %v269_v38 }
 0x103   :  { %v281_v45 = vpack.c.bf16 %v264_v42, %v261_v41  ;;  %883 = vmatprep.subr.bf16.mxu1 %v282_v43 }
 0x104   :  { %884 = vmatpush3.bf16.msra.mxu1 %v282_v43 }
 0x105   :  { %885 = vmatprep.subr.bf16.mxu1 %v281_v45 }
 0x108   :  { %886 = vmatpush3.bf16.msra.mxu1 %v281_v45 }
 0x109   :  { %887 = vmatprep.subr.bf16.mxu1 %v280_v47 }
 0x10c   :  { %888 = vmatpush3.bf16.msra.mxu1 %v280_v47 }
 0x10d   :  { %889 = vmatprep.subr.bf16.mxu1 %v279_v51 }
 0x110   :  { %890 = vmatpush3.bf16.msra.mxu1 %v279_v51 }
 0x111   :  { %891 = vmatprep.subr.bf16.mxu1 %v278_v53 }
 0x114   :  { %892 = vmatpush3.bf16.msra.mxu1 %v278_v53 }
 0x115   :  { %893 = vmatprep.subr.bf16.mxu1 %v277_v57 }
 0x118   :  { %894 = vmatpush3.bf16.msra.mxu1 %v277_v57 }
 0x119   :  { %895 = vmatprep.subr.bf16.mxu1 %v276_v59 }
 0x11c   :  { %896 = vmatpush3.bf16.msra.mxu1 %v276_v59 }
 0x11d   :  { %897 = vmatprep.subr.bf16.mxu1 %v275_v62 }
 0x120   :  { %898 = vmatpush3.bf16.msra.mxu1 %v275_v62 }
 0x123   :  { %900 = vmatmul.mubr.bf16.vlgmr.msra.gmra.mxu1 %v1126_v63 }
 0x124   :  { %903 = vmatprep.mubr.bf16.mxu1 %v1131_v0 }
 0x12b   :  { %904 = vmatmul.mubr.bf16.gmra.mxu1 %v1138_v1 }
 0x12c   :  { %907 = vmatprep.mubr.bf16.mxu1 %v1143_v2 }
 0x133   :  { %908 = vmatmul.mubr.bf16.gmra.mxu1 %v1150_v3 }
 0x134   :  { %911 = vmatprep.mubr.bf16.mxu1 %v1155_v4 }
 0x13b   :  { %912 = vmatmul.mubr.bf16.gmra.mxu1 %v1162_v5 }
 0x13c   :  { %963 = vmatprep.mubr.bf16.mxu1 %v1102_v16 }
 0x1e3   :  { %v901_v9 = vpop.f32.mrf.mxu1 }
 0x1e4   :  { %v381_v15 = vadd.f32 %v901_v9, %v769_v11 }
 0x1e5   :  { %v372_v10 = vpop.f32.mrf.mxu1 }
 0x1e6   :  { %v373_v13 = vadd.f32 %v769_v11, %v372_v10  ;;  %v437_v22 = vmax.f32 %v381_v15, 0.0 }
 0x1e7   :  { %v902_v12 = vpop.f32.mrf.mxu1 }
 0x1e8   :  { %v384_v14 = vadd.f32 %v902_v12, %v769_v11  ;;  %v435_v20 = vmax.f32 %v373_v13, 0.0 }
 0x1e9   :  { %v375_v16 = vpop.f32.mrf.mxu1 }
 0x1ea   :  { %v376_v17 = vadd.f32 %v769_v11, %v375_v16  ;;  %v438_v18 = vmax.f32 %v384_v14, 0.0 }
 0x1eb   :  { %v905_v19 = vpop.f32.mrf.mxu1 }
 0x1ec   :  { %v436_v21 = vmax.f32 %v376_v17, 0.0  ;;  %v452_v25 = vpack.c.bf16 %v438_v18, %v437_v22  ;;  %v397_v29 = vadd.f32 %v905_v19, %v769_v11 }
 0x1ed   :  { %v388_v23 = vpop.f32.mrf.mxu1 }
 0x1ee   :  { %v451_v24 = vpack.c.bf16 %v436_v21, %v435_v20  ;;  %v389_v27 = vadd.f32 %v769_v11, %v388_v23  ;;  %v441_v36 = vmax.f32 %v397_v29, 0.0  ;;  %v778_v23 = vld [vmem:[%s1242_s6] ss:$0 sm:$0xff] }
 0x1ef   :  { %v906_v26 = vpop.f32.mrf.mxu1 }
 0x1f0   :  { %v400_v28 = vadd.f32 %v906_v26, %v769_v11  ;;  %931 = vmatprep.mubr.bf16.mxu0 %v451_v24  ;;  %v439_v34 = vmax.f32 %v389_v27, 0.0 }
 0x1f1   :  { %v391_v30 = vpop.f32.mrf.mxu1  ;;  %932 = vmatmul.mubr.bf16.vlgmr.msra.gmra.mxu0 %v452_v25 }
 0x1f2   :  { %v392_v31 = vadd.f32 %v769_v11, %v391_v30  ;;  %v442_v32 = vmax.f32 %v400_v28, 0.0 }
 0x1f3   :  { %v909_v33 = vpop.f32.mrf.mxu1 }
 0x1f4   :  { %v440_v35 = vmax.f32 %v392_v31, 0.0  ;;  %v454_v39 = vpack.c.bf16 %v442_v32, %v441_v36  ;;  %v413_v43 = vadd.f32 %v909_v33, %v769_v11 }
 0x1f5   :  { %v404_v37 = vpop.f32.mrf.mxu1 }
 0x1f6   :  { %v453_v38 = vpack.c.bf16 %v440_v35, %v439_v34  ;;  %v405_v41 = vadd.f32 %v769_v11, %v404_v37  ;;  %v445_v50 = vmax.f32 %v413_v43, 0.0 }
 0x1f7   :  { %v910_v40 = vpop.f32.mrf.mxu1 }
 0x1f8   :  { %v416_v42 = vadd.f32 %v910_v40, %v769_v11  ;;  %935 = vmatprep.mubr.bf16.mxu0 %v453_v38  ;;  %v443_v48 = vmax.f32 %v405_v41, 0.0 }
 0x1f9   :  { %v407_v44 = vpop.f32.mrf.mxu1  ;;  %936 = vmatmul.mubr.bf16.gmra.mxu0 %v454_v39 }
 0x1fa   :  { %v408_v45 = vadd.f32 %v769_v11, %v407_v44  ;;  %v446_v46 = vmax.f32 %v416_v42, 0.0 }
 0x1fb   :  { %v913_v47 = vpop.f32.mrf.mxu1 }
 0x1fc   :  { %v444_v49 = vmax.f32 %v408_v45, 0.0  ;;  %v456_v53 = vpack.c.bf16 %v446_v46, %v445_v50  ;;  %v429_v57 = vadd.f32 %v913_v47, %v769_v11 }
 0x1fd   :  { %v420_v51 = vpop.f32.mrf.mxu1 }
 0x1fe   :  { %v455_v52 = vpack.c.bf16 %v444_v49, %v443_v48  ;;  %v421_v55 = vadd.f32 %v769_v11, %v420_v51  ;;  %v449_v6 = vmax.f32 %v429_v57, 0.0 }
 0x1ff   :  { %v914_v54 = vpop.f32.mrf.mxu1 }
 0x200   :  { %v432_v56 = vadd.f32 %v914_v54, %v769_v11  ;;  %939 = vmatprep.mubr.bf16.mxu0 %v455_v52  ;;  %v447_v61 = vmax.f32 %v421_v55, 0.0 }
 0x201   :  { %v423_v58 = vpop.f32.mrf.mxu1  ;;  %940 = vmatmul.mubr.bf16.gmra.mxu0 %v456_v53 }
 0x202   :  { %v424_v59 = vadd.f32 %v769_v11, %v423_v58  ;;  %v450_v60 = vmax.f32 %v432_v56, 0.0 }
 0x204   :  { %v448_v62 = vmax.f32 %v424_v59, 0.0  ;;  %v458_v8 = vpack.c.bf16 %v450_v60, %v449_v6 }
 0x206   :  { %v457_v7 = vpack.c.bf16 %v448_v62, %v447_v61 }
 0x208   :  { %943 = vmatprep.mubr.bf16.mxu0 %v457_v7 }
 0x209   :  { %944 = vmatmul.mubr.bf16.gmra.mxu0 %v458_v8 }
 0x2b1   :  { %v933_v9 = vpop.f32.mrf.mxu0 }
 0x2b2   :  { %v573_v45 = vadd.f32 %v933_v9, %v778_v23 }
 0x2b3   :  { %v564_v10 = vpop.f32.mrf.mxu0 }
 0x2b4   :  { %v565_v48 = vadd.f32 %v778_v23, %v564_v10 }
 0x2b5   :  { %v934_v12 = vpop.f32.mrf.mxu0 }
 0x2b6   :  { %v576_v43 = vadd.f32 %v934_v12, %v778_v23 }
 0x2b7   :  { %v567_v13 = vpop.f32.mrf.mxu0 }
 0x2b8   :  { %v628_v46 = vpack.c.bf16 %v576_v43, %v573_v45  ;;  %v568_v47 = vadd.f32 %v778_v23, %v567_v13 }
 0x2b9   :  { %v937_v14 = vpop.f32.mrf.mxu0 }
 0x2ba   :  { %v589_v39 = vadd.f32 %v937_v14, %v778_v23  ;;  %v627_v49 = vpack.c.bf16 %v568_v47, %v565_v48 }
 0x2bb   :  { %v580_v15 = vpop.f32.mrf.mxu0 }
 0x2bc   :  { %v581_v42 = vadd.f32 %v778_v23, %v580_v15 }
 0x2bd   :  { %v938_v16 = vpop.f32.mrf.mxu0 }
 0x2be   :  { %v592_v37 = vadd.f32 %v938_v16, %v778_v23 }
 0x2bf   :  { %v583_v17 = vpop.f32.mrf.mxu0 }
 0x2c0   :  { %v630_v40 = vpack.c.bf16 %v592_v37, %v589_v39  ;;  %v584_v41 = vadd.f32 %v778_v23, %v583_v17 }
 0x2c1   :  { %v941_v18 = vpop.f32.mrf.mxu0 }
 0x2c2   :  { %v605_v33 = vadd.f32 %v941_v18, %v778_v23  ;;  %v629_v44 = vpack.c.bf16 %v584_v41, %v581_v42 }
 0x2c3   :  { %v596_v19 = vpop.f32.mrf.mxu0 }
 0x2c4   :  { %v597_v36 = vadd.f32 %v778_v23, %v596_v19 }
 0x2c5   :  { %v942_v20 = vpop.f32.mrf.mxu0 }
 0x2c6   :  { %v608_v31 = vadd.f32 %v942_v20, %v778_v23 }
 0x2c7   :  { %v599_v11 = vpop.f32.mrf.mxu0 }
 0x2c8   :  { %v632_v34 = vpack.c.bf16 %v608_v31, %v605_v33  ;;  %v600_v35 = vadd.f32 %v778_v23, %v599_v11 }
 0x2c9   :  { %v945_v21 = vpop.f32.mrf.mxu0 }
 0x2ca   :  { %v621_v25 = vadd.f32 %v945_v21, %v778_v23  ;;  %v631_v38 = vpack.c.bf16 %v600_v35, %v597_v36 }
 0x2cb   :  { %v612_v22 = vpop.f32.mrf.mxu0 }
 0x2cc   :  { %v613_v28 = vadd.f32 %v778_v23, %v612_v22 }
 0x2cd   :  { %v946_v24 = vpop.f32.mrf.mxu0 }
 0x2ce   :  { %v624_v26 = vadd.f32 %v946_v24, %v778_v23 }
 0x2cf   :  { %v615_v27 = vpop.f32.mrf.mxu0 }
 0x2d0   :  { %v634_v29 = vpack.c.bf16 %v624_v26, %v621_v25  ;;  %v616_v30 = vadd.f32 %v778_v23, %v615_v27 }
 0x2d2   :  { %v633_v32 = vpack.c.bf16 %v616_v30, %v613_v28  ;;  %947 = vmatprep.subr.bf16.mxu1 %v634_v29 }
 0x2d3   :  { %948 = vmatpush3.bf16.msra.mxu1 %v634_v29 }
 0x2d4   :  { %949 = vmatprep.subr.bf16.mxu1 %v633_v32 }
 0x2d7   :  { %950 = vmatpush3.bf16.msra.mxu1 %v633_v32 }
 0x2d8   :  { %951 = vmatprep.subr.bf16.mxu1 %v632_v34 }
 0x2db   :  { %952 = vmatpush3.bf16.msra.mxu1 %v632_v34 }
 0x2dc   :  { %953 = vmatprep.subr.bf16.mxu1 %v631_v38 }
 0x2df   :  { %954 = vmatpush3.bf16.msra.mxu1 %v631_v38 }
 0x2e0   :  { %955 = vmatprep.subr.bf16.mxu1 %v630_v40 }
 0x2e3   :  { %956 = vmatpush3.bf16.msra.mxu1 %v630_v40 }
 0x2e4   :  { %957 = vmatprep.subr.bf16.mxu1 %v629_v44 }
 0x2e7   :  { %958 = vmatpush3.bf16.msra.mxu1 %v629_v44 }
 0x2e8   :  { %959 = vmatprep.subr.bf16.mxu1 %v628_v46 }
 0x2eb   :  { %960 = vmatpush3.bf16.msra.mxu1 %v628_v46 }
 0x2ec   :  { %961 = vmatprep.subr.bf16.mxu1 %v627_v49 }
 0x2ef   :  { %962 = vmatpush3.bf16.msra.mxu1 %v627_v49 }
 0x2f2   :  { %964 = vmatmul.mubr.bf16.vlgmr.msra.gmra.mxu1 %v1126_v63 }
 0x2f3   :  { %967 = vmatprep.mubr.bf16.mxu1 %v1131_v0 }
 0x2fa   :  { %968 = vmatmul.mubr.bf16.gmra.mxu1 %v1138_v1 }
 0x2fb   :  { %971 = vmatprep.mubr.bf16.mxu1 %v1143_v2 }
 0x302   :  { %972 = vmatmul.mubr.bf16.gmra.mxu1 %v1150_v3 }
 0x303   :  { %975 = vmatprep.mubr.bf16.mxu1 %v1155_v4 }
 0x30a   :  { %976 = vmatmul.mubr.bf16.gmra.mxu1 %v1162_v5 }
 0x3b2   :  { %v965_v50 = vpop.f32.mrf.mxu1 }
 0x3b3   :  { %734 = vst [vmem:[%s1243_s7 + $0x10] sm:$0xff] %v965_v50 }
 0x3b4   :  { %v669_v51 = vpop.f32.mrf.mxu1 }
 0x3b5   :  { %732 = vst [vmem:[%s1243_s7] sm:$0xff] %v669_v51 }
 0x3b6   :  { %v966_v63 = vpop.f32.mrf.mxu1 }
 0x3b7   :  { %735 = vst [vmem:[%s1243_s7 + $0x18] sm:$0xff] %v966_v63 }
 0x3b8   :  { %v672_v0 = vpop.f32.mrf.mxu1 }
 0x3b9   :  { %733 = vst [vmem:[%s1243_s7 + $0x8] sm:$0xff] %v672_v0 }
 0x3ba   :  { %v969_v1 = vpop.f32.mrf.mxu1 }
 0x3bb   :  { %738 = vst [vmem:[%s1243_s7 + $0x30] sm:$0xff] %v969_v1 }
 0x3bc   :  { %v685_v2 = vpop.f32.mrf.mxu1 }
 0x3bd   :  { %736 = vst [vmem:[%s1243_s7 + $0x20] sm:$0xff] %v685_v2 }
 0x3be   :  { %v970_v3 = vpop.f32.mrf.mxu1 }
 0x3bf   :  { %739 = vst [vmem:[%s1243_s7 + $0x38] sm:$0xff] %v970_v3 }
 0x3c0   :  { %v688_v4 = vpop.f32.mrf.mxu1 }
 0x3c1   :  { %737 = vst [vmem:[%s1243_s7 + $0x28] sm:$0xff] %v688_v4 }
 0x3c2   :  { %v973_v5 = vpop.f32.mrf.mxu1 }
 0x3c3   :  { %742 = vst [vmem:[%s1243_s7 + $0x50] sm:$0xff] %v973_v5 }
 0x3c4   :  { %v701_v52 = vpop.f32.mrf.mxu1 }
 0x3c5   :  { %740 = vst [vmem:[%s1243_s7 + $0x40] sm:$0xff] %v701_v52 }
 0x3c6   :  { %v974_v53 = vpop.f32.mrf.mxu1 }
 0x3c7   :  { %743 = vst [vmem:[%s1243_s7 + $0x58] sm:$0xff] %v974_v53 }
 0x3c8   :  { %v704_v54 = vpop.f32.mrf.mxu1 }
 0x3c9   :  { %741 = vst [vmem:[%s1243_s7 + $0x48] sm:$0xff] %v704_v54 }
 0x3ca   :  { %v977_v55 = vpop.f32.mrf.mxu1 }
 0x3cb   :  { %746 = vst [vmem:[%s1243_s7 + $0x70] sm:$0xff] %v977_v55 }
 0x3cc   :  { %v717_v56 = vpop.f32.mrf.mxu1 }
 0x3cd   :  { %744 = vst [vmem:[%s1243_s7 + $0x60] sm:$0xff] %v717_v56 }
 0x3ce   :  { %v978_v57 = vpop.f32.mrf.mxu1 }
 0x3cf   :  { %747 = vst [vmem:[%s1243_s7 + $0x78] sm:$0xff] %v978_v57 }
 0x3d0   :  { %v720_v58 = vpop.f32.mrf.mxu1 }
 0x3d1   :  { %745 = vst [vmem:[%s1243_s7 + $0x68] sm:$0xff] %v720_v58 }

</bundles_post_ra>
